<compile_context>
chip_gen: v6e
topology: v6e:2x2x1
jax: 0.10.0
libtpu: 0.0.40
codegen_flags: <defaults>
</compile_context>

<pallas_src>
import functools

import jax
import jax.numpy as jnp
from jax.experimental import pallas as pl
from jax.experimental.pallas import tpu as pltpu


# ---------------------------------------------------------------------------
# Small helpers
# ---------------------------------------------------------------------------
def _cdiv(a, b):
    return -(-a // b)


def _round_up(a, b):
    return _cdiv(a, b) * b


def _vmem_capacity_bytes():
    """Physical VMEM per core, with a conservative (v7x-sized) fallback."""
    try:
        cap = int(pltpu.get_tpu_info().vmem_capacity_bytes)
        if cap > 0:
            return cap
    except Exception:
        pass
    return 64 << 20


def _vmem_limit(block_bytes, cap):
    # 2x double-buffered h block + one block-sized in-kernel temporary +
    # output / scratch / qk + margin, capped safely below physical VMEM.
    need = 4 * block_bytes + (8 << 20)
    return int(min(max(need, 32 << 20), (cap * 3) // 4))


def _pick_rows(G, bytes_per_row, itemsize, budget):
    """Row tile: a multiple of the sublane packing step (16 for <4-byte
    dtypes, 8 for f32), sized so the h block is ~budget bytes.  Never falls
    back to the full axis for large G (grid uses cdiv + masked tail instead),
    and an axis that fits entirely is split into >= 2 blocks for megacore."""
    step = 16 if itemsize < 4 else 8
    if G <= step:
        return G
    fit = max(step, (budget // max(1, bytes_per_row)) // step * step)
    if fit < G:
        return fit
    return min(_round_up(_cdiv(G, 2), step), G)


# ---------------------------------------------------------------------------
# Kernels
# ---------------------------------------------------------------------------
def _pool_mid_kernel(h_ref, qk_ref, o_ref, m_ref, l_ref, acc_ref, *,
                     t_total, t_chunk, needs_mask):
    """3-D path: pool over T with an online (flash-style) softmax so T can be
    streamed in chunks.  h_ref: (tg, t_chunk, D); o_ref: (tg, D)."""
    s = pl.program_id(1)

    @pl.when(s == 0)
    def _():
        m_ref[...] = jnp.full(m_ref.shape, -jnp.inf, dtype=m_ref.dtype)
        l_ref[...] = jnp.zeros(l_ref.shape, dtype=l_ref.dtype)
        acc_ref[...] = jnp.zeros(acc_ref.shape, dtype=acc_ref.dtype)

    h = h_ref[...]                                      # (tg, tS, D) compute dtype
    qk = qk_ref[...]                                    # (1, D)      compute dtype

    if needs_mask:   # static: only when the last T chunk is partial
        col = (jax.lax.broadcasted_iota(jnp.int32, (h.shape[0], h.shape[1]), 1)
               + s * t_chunk)
        valid = col < t_total                           # (tg, tS)
        h = jnp.where(valid[..., None], h, jnp.zeros_like(h))

    # Logits directly in (tg, tS) layout; multiply stays in the compute dtype,
    # the reduction accumulates in f32.
    logits = jnp.sum(h * qk[None, :, :], axis=-1, dtype=jnp.float32)
    if needs_mask:
        logits = jnp.where(valid, logits, -jnp.inf)

    m_prev = m_ref[...]                                 # (tg, 1)
    m_new = jnp.maximum(m_prev, jnp.max(logits, axis=-1, keepdims=True))
    alpha = jnp.exp(m_prev - m_new)                     # (tg, 1)
    p = jnp.exp(logits - m_new)                         # (tg, tS) f32
    l_ref[...] = alpha * l_ref[...] + jnp.sum(p, axis=-1, keepdims=True)

    # Weighted pooling on the (otherwise idle) MXU: (tg,1,tS) x (tg,tS,D) ->
    # (tg,1,D).  Avoids a lane->sublane relayout of p and a block-sized f32
    # product.  The V projection is deferred to XLA on the pooled output.
    part = jnp.einsum("gqs,gsd->gqd", p[:, None, :].astype(h.dtype), h,
                      preferred_element_type=jnp.float32)[:, 0, :]
    acc_ref[...] = alpha * acc_ref[...] + part
    m_ref[...] = m_new

    @pl.when(s == pl.num_programs(1) - 1)
    def _():
        o_ref[...] = (acc_ref[...]
                      * pl.reciprocal(l_ref[...], approx=True)).astype(o_ref.dtype)


def _pool_lead_kernel(h_ref, qk_ref, o_ref):
    """4-D path: pool over the leading nL axis.  h_ref: (nL, tT, D) block cut
    straight out of (B, nL, T, D) (batch squeezed); o_ref: (tT, D)."""
    h = h_ref[...]                                      # (nL, tT, D)
    qk = qk_ref[...]                                    # (1, D)

    logits = jnp.sum(h * qk[None, :, :], axis=-1, dtype=jnp.float32)   # (nL, tT)
    m = jnp.max(logits, axis=0, keepdims=True)
    e = jnp.exp(logits - m)
    w = e * pl.reciprocal(jnp.sum(e, axis=0, keepdims=True), approx=True)

    # Pool h only; product kept in the compute dtype, f32 accumulation.
    prod = w.astype(h.dtype)[..., None] * h             # (nL, tT, D)
    o_ref[...] = jnp.sum(prod, axis=0, dtype=jnp.float32).astype(o_ref.dtype)


# ---------------------------------------------------------------------------
# pallas_call wrappers
# ---------------------------------------------------------------------------
def _attn_pool_3d(h, qk, *, block_bytes, cap):
    B, T, D = h.shape
    itemsize = h.dtype.itemsize
    step = 16 if itemsize < 4 else 8
    row_bytes = T * D * itemsize

    if step * row_bytes <= block_bytes:
        t_chunk = T                                   # whole softmax axis per block
        tg = _pick_rows(B, row_bytes, itemsize, block_bytes)
    else:
        tg = min(step, B)                             # minimal row tile, chunk T
        t_chunk = max(8, (block_bytes // max(1, tg * D * itemsize)) // 8 * 8)
        t_chunk = min(t_chunk, T)
    n_chunks = _cdiv(T, t_chunk)
    needs_mask = (T % t_chunk) != 0

    grid = (_cdiv(B, tg), n_chunks)
    blk_bytes = tg * t_chunk * D * itemsize
    kernel = functools.partial(_pool_mid_kernel, t_total=T, t_chunk=t_chunk,
                               needs_mask=needs_mask)
    return pl.pallas_call(
        kernel,
        out_shape=jax.ShapeDtypeStruct((B, D), h.dtype),
        grid_spec=pltpu.PrefetchScalarGridSpec(
            num_scalar_prefetch=0,
            grid=grid,
            in_specs=[
                pl.BlockSpec((tg, t_chunk, D), lambda i, s: (i, s, 0)),
                pl.BlockSpec((1, D), lambda i, s: (0, 0)),
            ],
            out_specs=pl.BlockSpec((tg, D), lambda i, s: (i, 0)),
            scratch_shapes=[
                pltpu.VMEM((tg, 1), jnp.float32),     # running max
                pltpu.VMEM((tg, 1), jnp.float32),     # running denominator
                pltpu.VMEM((tg, D), jnp.float32),     # running weighted sum of h
            ],
        ),
        compiler_params=pltpu.CompilerParams(
            dimension_semantics=("parallel", "arbitrary"),
            vmem_limit_bytes=_vmem_limit(blk_bytes, cap),
        ),
    )(h, qk)


def _attn_pool_4d(h, qk, *, block_bytes, cap):
    # No HBM transpose: block straight out of (B, nL, T, D), pool over nL.
    B, nL, T, D = h.shape
    itemsize = h.dtype.itemsize
    tT = _pick_rows(T, nL * D * itemsize, itemsize, block_bytes)
    grid = (B, _cdiv(T, tT))
    blk_bytes = nL * tT * D * itemsize
    # TODO(synk): no nL chunking — assumes nL * min_row_tile * D fits VMEM
    # (true for realistic layer counts).
    return pl.pallas_call(
        _pool_lead_kernel,
        out_shape=jax.ShapeDtypeStruct((B, T, D), h.dtype),
        grid_spec=pltpu.PrefetchScalarGridSpec(
            num_scalar_prefetch=0,
            grid=grid,
            in_specs=[
                # batch dim squeezed out of the kernel view
                pl.BlockSpec((None, nL, tT, D), lambda b, t: (b, 0, t, 0)),
                pl.BlockSpec((1, D), lambda b, t: (0, 0)),
            ],
            out_specs=pl.BlockSpec((None, tT, D), lambda b, t: (b, t, 0)),
        ),
        compiler_params=pltpu.CompilerParams(
            dimension_semantics=("parallel", "parallel"),
            vmem_limit_bytes=_vmem_limit(blk_bytes, cap),
        ),
    )(h, qk)


def attn_pool_1d(h, wk, wv, q, *, block_bytes=None):
    """Pallas implementation of AttnPool1D.forward.

    h : (B, T, D)      -> (B, D)     (pools over T)
    h : (B, nL, T, D)  -> (B, T, D)  (pools over nL per token position)
    wk, wv : (D, D) nn.Linear weights (y = x @ W.T);  q : (1, D) (or (1,1,D)).
    """
    if h.ndim not in (3, 4):
        raise ValueError("Input must be (B, T, D) or (B, nL, T, D)")
    compute_dtype = wk.dtype
    h = h.astype(compute_dtype)          # matches PyTorch's cast to weight dtype
    D = h.shape[-1]
    qv = q.reshape(1, D)

    # Fold the K projection and the 1/sqrt(D) scale into one (1, D) vector:
    #   logits = q . (h @ Wk^T) = h . (q @ Wk) * scale.
    qk = (jnp.dot(qv.astype(jnp.float32), wk.astype(jnp.float32))
          * (1.0 / float(D) ** 0.5)).astype(compute_dtype)

    cap = _vmem_capacity_bytes()
    if block_bytes is None:
        block_bytes = max(1 << 20, cap // 8)   # ~16 MiB v5e/v6e, ~8 MiB v7x

    if h.ndim == 3:
        pooled_h = _attn_pool_3d(h, qk, block_bytes=block_bytes, cap=cap)
    else:
        pooled_h = _attn_pool_4d(h, qk, block_bytes=block_bytes, cap=cap)

    # V projection deferred past the pooling (S-times less work; keeps the
    # (D, D) weight out of kernel VMEM entirely): pooled = pooled_h @ Wv^T.
    return jnp.matmul(pooled_h, wv.T.astype(pooled_h.dtype))


# ---------------------------------------------------------------------------
# Plain-JAX reference (matches the PyTorch forward)
# ---------------------------------------------------------------------------
def _reference(h, wk, wv, q):
    h = h.astype(jnp.float32)
    q = q.reshape(1, -1)
    if h.ndim == 3:
        B, T, D = h.shape
        k = h @ wk.T
        v = h @ wv.T
        logits = jnp.einsum("d,btd->bt", q[0], k) / (D ** 0.5)
        w = jax.nn.softmax(logits, axis=-1)
        return jnp.einsum("bt,btd->bd", w, v)
    else:
        B, nL, T, D = h.shape
        hp = jnp.transpose(h, (0, 2, 1, 3))        # (B, T, nL, D)
        k = hp @ wk.T
        v = hp @ wv.T
        logits = jnp.einsum("d,btld->btl", q[0], k) / (D ** 0.5)
        w = jax.nn.softmax(logits, axis=-1)
        return jnp.einsum("btl,btld->btd", w, v)


if __name__ == "__main__":
    d_model = 32
    B, nL, T = 2, 4, 8

    key = jax.random.PRNGKey(0)
    kq, kk, kv, kh3, kh4 = jax.random.split(key, 5)

    # Deterministic "parameters" (shapes from AttnPool1D.__init__)
    q = jax.random.normal(kq, (1, d_model), dtype=jnp.float32)
    wk = jax.random.normal(kk, (d_model, d_model), dtype=jnp.float32) * 0.1
    wv = jax.random.normal(kv, (d_model, d_model), dtype=jnp.float32) * 0.1

    # 3-D input case: (B, T, D) -> (B, D)
    h3 = jax.random.normal(kh3, (B, T, d_model), dtype=jnp.float32)
    out3 = jax.block_until_ready(attn_pool_1d(h3, wk, wv, q))
    ref3 = _reference(h3, wk, wv, q)
    assert out3.shape == (B, d_model)
    assert jnp.allclose(out3, ref3, atol=2e-3, rtol=2e-3), "3D mismatch"

    # 4-D input case: (B, nL, T, D) -> (B, T, D)
    h4 = jax.random.normal(kh4, (B, nL, T, d_model), dtype=jnp.float32)
    out4 = jax.block_until_ready(attn_pool_1d(h4, wk, wv, q))
    ref4 = _reference(h4, wk, wv, q)
    assert out4.shape == (B, T, d_model)
    assert jnp.allclose(out4, ref4, atol=2e-3, rtol=2e-3), "4D mismatch"

    # Exercise the chunked online-softmax path (T split into chunks + masked
    # partial tail chunk) with a forced tiny block budget and lane-aligned D.
    d2, B2, T2 = 128, 16, 44
    kq2, kk2, kv2, kh5 = jax.random.split(jax.random.PRNGKey(0), 4)
    q_b = jax.random.normal(kq2, (1, d2), dtype=jnp.float32)
    wk_b = jax.random.normal(kk2, (d2, d2), dtype=jnp.float32) * 0.1
    wv_b = jax.random.normal(kv2, (d2, d2), dtype=jnp.float32) * 0.1
    h5 = jax.random.normal(kh5, (B2, T2, d2), dtype=jnp.float32)
    out5 = jax.block_until_ready(
        attn_pool_1d(h5, wk_b, wv_b, q_b, block_bytes=16 * 1024))
    ref5 = _reference(h5, wk_b, wv_b, q_b)
    assert out5.shape == (B2, d2)
    assert jnp.allclose(out5, ref5, atol=2e-3, rtol=2e-3), "chunked 3D mismatch"

    print("KERNEL_OK")
</pallas_src>

<mosaic_0001>
module attributes {stable_mosaic.version = 11 : i64} {
  func.func @_pool_mid_kernel(%arg0: i32, %arg1: i32, %arg2: memref<2x8x32xf32, #tpu.memory_space<vmem>>, %arg3: memref<1x32xf32, #tpu.memory_space<vmem>>, %arg4: memref<2x32xf32, #tpu.memory_space<vmem>>, %arg5: memref<2x1xf32, #tpu.memory_space<vmem>>, %arg6: memref<2x1xf32, #tpu.memory_space<vmem>>, %arg7: memref<2x32xf32, #tpu.memory_space<vmem>>) attributes {dimension_semantics = [#tpu.dimension_semantics<parallel>, #tpu.dimension_semantics<arbitrary>], iteration_bounds = array<i64: 1, 1>, scalar_prefetch = 0 : i64, scratch_operands = 3 : i64, tpu.core_type = #tpu.core_type<tc>, window_params = [{transform_indices = @transform_0, window_bounds = array<i64: 2, 8, 32>}, {pipeline_mode = #tpu.pipeline_mode<synchronous>, transform_indices = @transform_1, window_bounds = array<i64: 1, 32>}, {transform_indices = @transform_2, window_bounds = array<i64: 2, 32>}]} {
    %c0_i32 = arith.constant 0 : i32
    %0 = arith.cmpi eq, %arg1, %c0_i32 : i32
    %1 = arith.extui %0 : i1 to i32
    %c0_i32_0 = arith.constant 0 : i32
    %2 = arith.cmpi ne, %1, %c0_i32_0 : i32
    scf.if %2 {
      %cst_22 = arith.constant 0xFF800000 : f32
      %36 = vector.broadcast %cst_22 : f32 to vector<2x1xf32>
      %c0_23 = arith.constant 0 : index
      %c0_24 = arith.constant 0 : index
      %37 = vector.load %arg5[%c0_23, %c0_24] : memref<2x1xf32, #tpu.memory_space<vmem>>, vector<2x1xf32>
      tpu.vector_store %arg5[%c0_23, %c0_24], %36 {strides = array<i32>} : memref<2x1xf32, #tpu.memory_space<vmem>>, vector<2x1xf32>,
      %cst_25 = arith.constant 0.000000e+00 : f32
      %38 = vector.broadcast %cst_25 : f32 to vector<2x1xf32>
      %c0_26 = arith.constant 0 : index
      %c0_27 = arith.constant 0 : index
      %39 = vector.load %arg6[%c0_26, %c0_27] : memref<2x1xf32, #tpu.memory_space<vmem>>, vector<2x1xf32>
      tpu.vector_store %arg6[%c0_26, %c0_27], %38 {strides = array<i32>} : memref<2x1xf32, #tpu.memory_space<vmem>>, vector<2x1xf32>,
      %cst_28 = arith.constant 0.000000e+00 : f32
      %40 = vector.broadcast %cst_28 : f32 to vector<2x32xf32>
      %c0_29 = arith.constant 0 : index
      %c0_30 = arith.constant 0 : index
      %41 = vector.load %arg7[%c0_29, %c0_30] : memref<2x32xf32, #tpu.memory_space<vmem>>, vector<2x32xf32>
      tpu.vector_store %arg7[%c0_29, %c0_30], %40 {strides = array<i32>} : memref<2x32xf32, #tpu.memory_space<vmem>>, vector<2x32xf32>,
    } else {
    }
    %c0 = arith.constant 0 : index
    %c0_1 = arith.constant 0 : index
    %c0_2 = arith.constant 0 : index
    %3 = vector.load %arg2[%c0, %c0_1, %c0_2] : memref<2x8x32xf32, #tpu.memory_space<vmem>>, vector<2x8x32xf32>
    %c0_3 = arith.constant 0 : index
    %c0_4 = arith.constant 0 : index
    %4 = vector.load %arg3[%c0_3, %c0_4] : memref<1x32xf32, #tpu.memory_space<vmem>>, vector<1x32xf32>
    %5 = vector.shape_cast %4 : vector<1x32xf32> to vector<1x1x32xf32>
    %6 = vector.broadcast %5 : vector<1x1x32xf32> to vector<2x8x32xf32>
    %7 = arith.mulf %3, %6 : vector<2x8x32xf32>
    %cst = arith.constant dense<0.000000e+00> : vector<2x8xf32>
    %8 = vector.multi_reduction <add>, %7, %cst [2] : vector<2x8x32xf32> to vector<2x8xf32>
    %c0_5 = arith.constant 0 : index
    %c0_6 = arith.constant 0 : index
    %9 = vector.load %arg5[%c0_5, %c0_6] : memref<2x1xf32, #tpu.memory_space<vmem>>, vector<2x1xf32>
    %cst_7 = arith.constant dense<0xFF800000> : vector<2xf32>
    %10 = vector.multi_reduction <maximumf>, %8, %cst_7 [1] : vector<2x8xf32> to vector<2xf32>
    %11 = vector.shape_cast %10 : vector<2xf32> to vector<2x1xf32>
    %12 = arith.maximumf %9, %11 : vector<2x1xf32>
    %13 = arith.subf %9, %12 : vector<2x1xf32>
    %14 = math.exp %13 : vector<2x1xf32>
    %15 = vector.broadcast %12 : vector<2x1xf32> to vector<2x8xf32>
    %16 = arith.subf %8, %15 : vector<2x8xf32>
    %17 = math.exp %16 : vector<2x8xf32>
    %c0_8 = arith.constant 0 : index
    %c0_9 = arith.constant 0 : index
    %18 = vector.load %arg6[%c0_8, %c0_9] : memref<2x1xf32, #tpu.memory_space<vmem>>, vector<2x1xf32>
    %19 = arith.mulf %14, %18 : vector<2x1xf32>
    %cst_10 = arith.constant dense<0.000000e+00> : vector<2xf32>
    %20 = vector.multi_reduction <add>, %17, %cst_10 [1] : vector<2x8xf32> to vector<2xf32>
    %21 = vector.shape_cast %20 : vector<2xf32> to vector<2x1xf32>
    %22 = arith.addf %19, %21 : vector<2x1xf32>
    %c0_11 = arith.constant 0 : index
    %c0_12 = arith.constant 0 : index
    %23 = vector.load %arg6[%c0_11, %c0_12] : memref<2x1xf32, #tpu.memory_space<vmem>>, vector<2x1xf32>
    tpu.vector_store %arg6[%c0_11, %c0_12], %22 {strides = array<i32>} : memref<2x1xf32, #tpu.memory_space<vmem>>, vector<2x1xf32>,
    %24 = vector.shape_cast %17 : vector<2x8xf32> to vector<2x1x8xf32>
    "tpu.trace_start"() <{level = 10 : i32, message = "gqs,gsd->gqd"}> : () -> ()
    %cst_13 = arith.constant dense<0.000000e+00> : vector<2x1x32xf32>
    %25 = tpu.matmul %24, %3, %cst_13 {dimension_numbers = #tpu.dot_dimension_numbers<[2], [1], [1], [2], [0, 0, 0, 1, 1, 2], [0], [0]>} : vector<2x1x8xf32>, vector<2x8x32xf32>, vector<2x1x32xf32> -> vector<2x1x32xf32>
    "tpu.trace_stop"() : () -> ()
    %26 = vector.shape_cast %25 : vector<2x1x32xf32> to vector<2x32xf32>
    %c0_14 = arith.constant 0 : index
    %c0_15 = arith.constant 0 : index
    %27 = vector.load %arg7[%c0_14, %c0_15] : memref<2x32xf32, #tpu.memory_space<vmem>>, vector<2x32xf32>
    %28 = vector.broadcast %14 : vector<2x1xf32> to vector<2x32xf32>
    %29 = arith.mulf %28, %27 : vector<2x32xf32>
    %30 = arith.addf %29, %26 : vector<2x32xf32>
    %c0_16 = arith.constant 0 : index
    %c0_17 = arith.constant 0 : index
    %31 = vector.load %arg7[%c0_16, %c0_17] : memref<2x32xf32, #tpu.memory_space<vmem>>, vector<2x32xf32>
    tpu.vector_store %arg7[%c0_16, %c0_17], %30 {strides = array<i32>} : memref<2x32xf32, #tpu.memory_space<vmem>>, vector<2x32xf32>,
    %c0_18 = arith.constant 0 : index
    %c0_19 = arith.constant 0 : index
    %32 = vector.load %arg5[%c0_18, %c0_19] : memref<2x1xf32, #tpu.memory_space<vmem>>, vector<2x1xf32>
    tpu.vector_store %arg5[%c0_18, %c0_19], %12 {strides = array<i32>} : memref<2x1xf32, #tpu.memory_space<vmem>>, vector<2x1xf32>,
    %c0_i32_20 = arith.constant 0 : i32
    %33 = arith.cmpi eq, %arg1, %c0_i32_20 : i32
    %34 = arith.extui %33 : i1 to i32
    %c0_i32_21 = arith.constant 0 : i32
    %35 = arith.cmpi ne, %34, %c0_i32_21 : i32
    scf.if %35 {
      %c0_22 = arith.constant 0 : index
      %c0_23 = arith.constant 0 : index
      %36 = vector.load %arg7[%c0_22, %c0_23] : memref<2x32xf32, #tpu.memory_space<vmem>>, vector<2x32xf32>
      %c0_24 = arith.constant 0 : index
      %c0_25 = arith.constant 0 : index
      %37 = vector.load %arg6[%c0_24, %c0_25] : memref<2x1xf32, #tpu.memory_space<vmem>>, vector<2x1xf32>
      %38 = tpu.reciprocal %37 {approx = true} : vector<2x1xf32> -> vector<2x1xf32>
      %39 = vector.broadcast %38 : vector<2x1xf32> to vector<2x32xf32>
      %40 = arith.mulf %36, %39 : vector<2x32xf32>
      %c0_26 = arith.constant 0 : index
      %c0_27 = arith.constant 0 : index
      %41 = vector.load %arg4[%c0_26, %c0_27] : memref<2x32xf32, #tpu.memory_space<vmem>>, vector<2x32xf32>
      tpu.vector_store %arg4[%c0_26, %c0_27], %40 {strides = array<i32>} : memref<2x32xf32, #tpu.memory_space<vmem>>, vector<2x32xf32>,
    } else {
    }
    return
  }
  func.func @transform_0(%arg0: i32, %arg1: i32) -> (i32, i32, i32) {
    %c0_i32 = arith.constant 0 : i32
    %c0_i32_0 = arith.constant 0 : i32
    return %arg0, %arg1, %c0_i32 : i32, i32, i32
  }
  func.func @transform_1(%arg0: i32, %arg1: i32) -> (i32, i32) {
    %c0_i32 = arith.constant 0 : i32
    %c0_i32_0 = arith.constant 0 : i32
    %c0_i32_1 = arith.constant 0 : i32
    return %c0_i32, %c0_i32_0 : i32, i32
  }
  func.func @transform_2(%arg0: i32, %arg1: i32) -> (i32, i32) {
    %c0_i32 = arith.constant 0 : i32
    %c0_i32_0 = arith.constant 0 : i32
    return %arg0, %c0_i32 : i32, i32
  }
}

</mosaic_0001>

<bundles_post_ra>
// kernel: tpu_custom_call.1
= control target key start
LH: loop header
LB: loop body
LE: loop exit
PB: predicated region body
PF: predicated region fallthrough
CT: control target
= control target key end

     0   :  { %7 = vsyncpa [#allocation6], 0  ;;  %s435_s0 = inlined_call_operand.hbm [shape: f32[2,8,32], index: 0, kind: input, shape index: {}]   ;;  %s436_s1 = inlined_call_operand.vmem [shape: f32[1,32], index: 1, kind: input, shape index: {}]   ;;  %s437_s2 = inlined_call_operand.hbm [shape: f32[2,32], index: 2, kind: output, shape index: {}]  }
   0x1   :  { %8 = vsyncpa [#allocation7], 0  ;;  %s391_s9 = smov [#allocation5]  }
   0x2   :  { %s14_s10 = sshll.u32 %s391_s9, 4  ;;  %s15_s10 = int_to_ptr.vmem [resolvable:$true] %s14_s10 }
   0x3   :  { %s355_s11 = scalar_lea.vmem %s15_s10, 256  ;;  %p360_p1 = scmp.lt.s32.totalorder %s15_s10, %s15_s10 }
   0x4   :  { %p356_p0 = scmp.ne.s32.totalorder %s15_s10, %s355_s11  ;;  %p361_p2 = scmp.lt.s32.totalorder %s355_s11, %s355_s11 }
   0x6   :  { %p362_p3 = por %p361_p2, %p360_p1 }
   0x8   :  { %p363_p4 = pnand %p362_p3, %p356_p0 }
   0xa   :  { %366 = shalt.err (!%p363_p4)
}
   0xb   :  { %s392_s12 = smov 128   ;;  %s393_s13 = smov 8  }
   0xc   :  { %20 = dma.hbm_to_vmem [thread:$0]  %s435_s0, 256, %s15_s10, [#allocation6], %s392_s12, %s392_s12, %s393_s13  }
   0xd   :  { %387 = dma.done.wait [#allocation6], 256  }
   0xe   :  { %388 = vsyncadd [#allocation6], 4294967040  ;;  %v35_v0 = vld [vmem:[#allocation5] sm:$0xff]  ;;  %v312_v1 = vld [vmem:[%s436_s1] ss:$0 sm:$0xff]  ;;  %vm46_vm0 = vcmask 261120   ;;  %v56_v8 = vlaneseq }
   0xf   :  { %v36_v2 = vld [vmem:[#allocation5 + $0x8] sm:$0xff]  ;;  %v44_v3 = vmul.f32 %v312_v1, %v35_v0  ;;  %vm30_vm1 = vcmask 1024   ;;  %v394_v7 = vmov -inf   ;;  %vm66_vm2 = vcmask 1041409   ;;  %s398_s0 = smov [#allocation8]  }
  0x10   :  { %v45_v4 = vmul.f32 %v312_v1, %v36_v2  ;;  %31 = vst.msk [vmem:[#allocation2] sm:$0x3] %vm30_vm1, %v394_v7  ;;  %v57_v9 = vand.u32 127, %v56_v8  ;;  %v59_v10 = vshrl.u32 %v56_v8, 7  ;;  %vm69_vm3 = vcmask 58368   ;;  %s303_s1 = sshll.u32 %s398_s0, 4  ;;  %s304_s1 = int_to_ptr.vmem [resolvable:$true] %s303_s1 }
  0x11   :  { %v47_v5 = vsel %vm46_vm0, %v44_v3, 0.0  ;;  %v395_v18 = vmov 0   ;;  %v396_v19 = vmov 0.0   ;;  %vm33_vm4 = vcmask 254976   ;;  %s367_s18 = scalar_lea.vmem %s304_s1, 32  ;;  %p372_p6 = scmp.lt.s32.totalorder %s304_s1, %s304_s1 }
  0x12   :  { %48 = vadd.xlane.f32.xlu0 %v47_v5  ;;  %v50_v6 = vsel %vm46_vm0, %v45_v4, 0.0  ;;  %v60_v12 = vsub.s32 %v57_v9, %v59_v10  ;;  %337 = vset.pattern.permute.xlu1 %v395_v18  ;;  %32 = vst.msk [vmem:[#allocation3] sm:$0x3] %vm30_vm1, %v396_v19  ;;  %v83_v24 = vsub.s32 0, %v59_v10  ;;  %v87_v25 = vsub.s32 1, %v59_v10  ;;  %p368_p5 = scmp.ne.s32.totalorder %s304_s1, %s367_s18  ;;  %p373_p7 = scmp.lt.s32.totalorder %s367_s18, %s367_s18 }
  0x13   :  { %338 = vset.pattern.permute.xlu0 %v395_v18  ;;  %319 = vmatprep.subr.mxu0 %v396_v19  ;;  %34 = vst.msk [vmem:[#allocation4] sm:$0x3] %vm33_vm4, %v396_v19  ;;  %vm397_vm5 = vmmov 0   ;;  %vm123_vm6 = vcmask 64512  }
  0x14   :  { %324 = vmatprep.subr.mxu1 %v396_v19  ;;  %320 = vmatpush3.msra.mxu0 %v35_v0  ;;  %p374_p8 = por %p373_p7, %p372_p6 }
  0x15   :  { %325 = vmatpush3.msra.mxu1 %v36_v2  ;;  %321 = vmatprep.mubr.msk.f32.mxu0 %vm397_vm5, %v396_v19 }
  0x16   :  { %51 = vadd.xlane.f32.xlu0 %v50_v6  ;;  %326 = vmatprep.mubr.msk.f32.mxu1 %vm397_vm5, %v396_v19  ;;  %p375_p9 = pnand %p374_p8, %p368_p5 }
  0x17   :  { %v53_v20 = vld [vmem:[#allocation2] sm:$0x3] }
  0x19   :  { %v97_v43 = vld [vmem:[#allocation3] sm:$0x3] }
  0x1a   :  { %v268_v49 = vld [vmem:[#allocation4] sm:$0x3] }
  0x9b   :  { %v49_v11 = vpop.xlane.xlu0 %48 }
  0x9c   :  { %v61_v14 = vrot.slane %v49_v11, %v60_v12 }
  0x9f   :  { %v52_v13 = vpop.xlane.xlu0 %51 }
  0xa0   :  { %v65_v15 = vrot.slane %v52_v13, %v60_v12 }
  0xa2   :  { %v67_v16 = vsel %vm66_vm2, %v65_v15, %v61_v14 }
  0xa3   :  { %v70_v17 = vsel %vm69_vm3, %v67_v16, -inf }
  0xa4   :  { %71 = vmax.xlane.f32.xlu1 %v70_v17 }
 0x12d   :  { %v72_v21 = vpop.xlane.xlu1 %71 }
 0x12e   :  { %v73_v22 = vmax.f32 %v53_v20, %v72_v21 }
 0x130   :  { %v74_v23 = vsub.f32 %v53_v20, %v73_v22  ;;  %283 = vst.msk [vmem:[#allocation2] sm:$0x3] %vm30_vm1, %v73_v22  ;;  %79 = vperm.xlu1 %337, %v73_v22  }
 0x132   :  { %v75_v33 = vmul.f32 1.442695, %v74_v23 }
 0x1ab   :  { %v80_v26 = vpop.permute.xlu1 %79 }
 0x1ac   :  { %v84_v27 = vrot.slane %v80_v26, %v83_v24  ;;  %v88_v28 = vrot.slane %v80_v26, %v87_v25 }
 0x1ae   :  { %v91_v29 = vsub.f32 %v49_v11, %v84_v27  ;;  %v92_v30 = vsub.f32 %v52_v13, %v88_v28 }
 0x1b0   :  { %v93_v31 = vmul.f32 1.442695, %v91_v29  ;;  %v95_v32 = vmul.f32 1.442695, %v92_v30 }
 0x1b2   :  { %339 = vpow2.f32 %v93_v31 }
 0x1b3   :  { %341 = vpow2.f32 %v95_v32 }
 0x1b4   :  { %343 = vpow2.f32 %v75_v33 }
 0x1bf   :  { %v340_v34 = vpop.eup %339 }
 0x1c0   :  { %v342_v35 = vpop.eup %341  ;;  %102 = vperm.xlu1 %337, %v340_v34  }
 0x1c1   :  { %105 = vperm.xlu0 %338, %v342_v35   ;;  %v344_v36 = vpop.eup %343 }
 0x1c2   :  { %v98_v44 = vmul.f32 %v344_v36, %v97_v43 }
 0x1c5   :  { %271 = vperm.xlu0 %338, %v344_v36  }
 0x23b   :  { %v103_v37 = vpop.permute.xlu1 %102 }
 0x23c   :  { %v106_v38 = vpop.permute.xlu0 %105  ;;  %v110_v39 = vrot.slane %v103_v37, %v60_v12 }
 0x23d   :  { %v114_v40 = vrot.slane %v106_v38, %v60_v12 }
 0x23e   :  { %322 = vmatmul.mubr.msk.f32.vlgmr.msra.gmra.mxu0 %vm123_vm6, %v110_v39 }
 0x23f   :  { %327 = vmatmul.mubr.msk.f32.vlgmr.msra.gmra.mxu1 %vm123_vm6, %v114_v40  ;;  %v115_v41 = vsel %vm66_vm2, %v114_v40, %v110_v39 }
 0x240   :  { %v117_v42 = vsel %vm69_vm3, %v115_v41, 0.0  ;;  %v272_v50 = vpop.permute.xlu0 %271 }
 0x241   :  { %118 = vadd.xlane.f32.xlu1 %v117_v42  ;;  %v274_v55 = vmul.f32 %v272_v50, %v268_v49 }
 0x2ca   :  { %v119_v45 = vpop.xlane.xlu1 %118 }
 0x2cb   :  { %v120_v46 = vadd.f32 %v119_v45, %v98_v44 }
 0x2cd   :  { %122 = vst.msk [vmem:[#allocation3] sm:$0x3] %vm30_vm1, %v120_v46 }
 0x2d4   :  { %v288_v47 = vld [vmem:[#allocation3] sm:$0x3] }
 0x2d5   :  { %345 = vrcp.f32 %v288_v47 }
 0x2e2   :  { %v346_v48 = vpop.eup %345 }
 0x2e3   :  { %292 = vperm.xlu0 %338, %v346_v48  }
 0x2fe   :  { %v192_v51 = vpop.f32.mrf.mxu0 }
 0x2ff   :  { %v264_v52 = vpop.f32.mrf.mxu1 }
 0x300   :  { %v277_v53 = vrot.slane %v264_v52, 7  ;;  %v323_v54 = vpop.f32.mrf.mxu0 }
 0x301   :  { %v328_v56 = vpop.f32.mrf.mxu1 }
 0x302   :  { %v278_v57 = vsel %vm66_vm2, %v277_v53, %v192_v51 }
 0x303   :  { %v280_v58 = vadd.f32 %v278_v57, %v274_v55 }
 0x305   :  { %282 = vst.msk [vmem:[#allocation4] sm:$0x3] %vm33_vm4, %v280_v58 }
 0x30c   :  { %v287_v59 = vld [vmem:[#allocation4] sm:$0x3] }
 0x35e   :  { %v293_v60 = vpop.permute.xlu0 %292 }
 0x35f   :  { %v295_v61 = vmul.f32 %v293_v60, %v287_v59 }
 0x361   :  { %296 = vst.msk [vmem:[#allocation8] sm:$0x3] %vm33_vm4, %v295_v61 }
 0x362   :  { %378 = shalt.err (!%p375_p9)
}
 0x363   :  { %306 = dma.vmem_to_hbm [thread:$0]  %s304_s1, 32, %s437_s2, [#allocation7]  }
 0x364   :  { %389 = dma.done.wait [#allocation7], 32  }
 0x365   :  { %390 = vsyncadd [#allocation7], 4294967264 }
 0x366   :  { %310 = vsyncpa [#allocation6], 1 }
 0x367   :  { %311 = vsyncpa [#allocation7], 1 }

</bundles_post_ra>
